<compile_context>
chip_gen: v7x
topology: tpu7x:2x2x1
jax: 0.10.0
libtpu: 0.0.40
codegen_flags: <defaults>
</compile_context>

<pallas_src>
import functools

import jax
import jax.numpy as jnp
from jax.experimental import pallas as pl
from jax.experimental.pallas import tpu as pltpu

# Pendulum-v0 dimensions.
STATE_SIZE = 3
ACTION_SIZE = 1
HIDDEN_SIZE = 64
ACTION_MAX = 2.0

HIDDEN_PAD = 128     # hidden dim zero-padded to exactly one lane width
LANE = 128           # batch lives on lanes -> batch tiles are multiples of 128
TILE_B_MAX = 2048    # ~3 MiB/step incl. double buffers: fits every gen's scoped VMEM


def _round_up(n, m):
    return ((n + m - 1) // m) * m


def actor_kernel(x_ref, w1_ref, b1_ref, w2_ref, b2_ref, w3_ref, b3_ref,
                 out_ref, *, action_max, state_size):
    # Batch-on-lanes layout: every activation is (features, tile_b).
    x = jnp.clip(x_ref[...], -1.1, 1.1)                      # (state_size, tile_b)

    # Layer 1: K == state_size (3) -> 3 VPU broadcast FMAs, no MXU push.
    h1 = b1_ref[...] + w1_ref[:, 0:1] * x[0:1, :]            # (HIDDEN_PAD, tile_b)
    for s in range(1, state_size):
        h1 = h1 + w1_ref[:, s:s + 1] * x[s:s + 1, :]
    h1 = jnp.maximum(h1, 0.0)

    # Layer 2: the one real MXU matmul; W2 kept in PyTorch (out, in) layout.
    h2 = jnp.dot(w2_ref[...], h1, preferred_element_type=jnp.float32)
    h2 = jnp.maximum(h2 + b2_ref[...], 0.0)                  # (HIDDEN_PAD, tile_b)

    # Layer 3: (action, hidden) @ (hidden, tile_b) -> lane-dense (action, tile_b).
    y = jnp.dot(w3_ref[...], h2, preferred_element_type=jnp.float32)
    y = jnp.tanh(y + b3_ref[...]) * action_max

    out_ref[...] = y.astype(out_ref.dtype)


def pack_params(w1, b1, w2, b2, w3, b3):
    """One-time packing for the batch-on-lanes layout.

    Weights stay in PyTorch (out, in) orientation (h = W @ x in column layout);
    the hidden dim is zero-padded to 128 so every matmul operand is lane-dense.
    Padded rows/cols are exactly zero -> forward math is unchanged.
    Call once and reuse; do NOT re-pack every forward step.
    """
    f32 = jnp.float32
    w1_p = jnp.zeros((HIDDEN_PAD, STATE_SIZE), f32).at[:HIDDEN_SIZE, :].set(w1.astype(f32))
    b1_p = jnp.zeros((HIDDEN_PAD, 1), f32).at[:HIDDEN_SIZE, 0].set(b1.astype(f32))
    w2_p = jnp.zeros((HIDDEN_PAD, HIDDEN_PAD), f32).at[:HIDDEN_SIZE, :HIDDEN_SIZE].set(w2.astype(f32))
    b2_p = jnp.zeros((HIDDEN_PAD, 1), f32).at[:HIDDEN_SIZE, 0].set(b2.astype(f32))
    w3_p = jnp.zeros((ACTION_SIZE, HIDDEN_PAD), f32).at[:, :HIDDEN_SIZE].set(w3.astype(f32))
    b3_p = b3.reshape(ACTION_SIZE, 1).astype(f32)
    return w1_p, b1_p, w2_p, b2_p, w3_p, b3_p


@functools.partial(jax.jit, static_argnames=("action_max",))
def actor_forward(x, w1_p, b1_p, w2_p, b2_p, w3_p, b3_p, *, action_max=ACTION_MAX):
    """x: [batch, STATE_SIZE] float; packed params from pack_params()."""
    batch = x.shape[0]
    x_t = x.astype(jnp.float32).T                   # (STATE_SIZE, batch): batch on lanes

    # Tile selection: lane-aligned (128), capped at TILE_B_MAX, and when the
    # batch spans more than one lane group keep >= 2 grid steps so v7x's two
    # TensorCores can split the "parallel" batch axis.
    batch_pad_min = _round_up(max(batch, 1), LANE)
    if batch_pad_min <= LANE:
        tile_b = LANE
    else:
        tile_b = min(TILE_B_MAX, _round_up(-(-batch_pad_min // 2), LANE))
    padded_batch = _round_up(batch, tile_b)
    if padded_batch != batch:
        x_t = jnp.zeros((STATE_SIZE, padded_batch), jnp.float32).at[:, :batch].set(x_t)

    grid = (padded_batch // tile_b,)
    const = lambda i: (0, 0)

    cost = pl.CostEstimate(
        flops=2 * padded_batch * (STATE_SIZE * HIDDEN_SIZE
                                  + HIDDEN_SIZE * HIDDEN_SIZE
                                  + HIDDEN_SIZE * ACTION_SIZE),
        transcendentals=padded_batch * ACTION_SIZE,
        bytes_accessed=4 * (padded_batch * (STATE_SIZE + ACTION_SIZE)
                            + HIDDEN_PAD * STATE_SIZE
                            + HIDDEN_PAD * HIDDEN_PAD
                            + ACTION_SIZE * HIDDEN_PAD
                            + 2 * HIDDEN_PAD + ACTION_SIZE),
    )

    out = pl.pallas_call(
        functools.partial(actor_kernel, action_max=action_max,
                          state_size=STATE_SIZE),
        out_shape=jax.ShapeDtypeStruct((ACTION_SIZE, padded_batch), jnp.float32),
        grid=grid,
        in_specs=[
            pl.BlockSpec((STATE_SIZE, tile_b), lambda i: (0, i)),    # x^T: tiled over batch (lanes)
            pl.BlockSpec((HIDDEN_PAD, STATE_SIZE), const),           # W1 (resident)
            pl.BlockSpec((HIDDEN_PAD, 1), const),                    # b1
            pl.BlockSpec((HIDDEN_PAD, HIDDEN_PAD), const),           # W2
            pl.BlockSpec((HIDDEN_PAD, 1), const),                    # b2
            pl.BlockSpec((ACTION_SIZE, HIDDEN_PAD), const),          # W3
            pl.BlockSpec((ACTION_SIZE, 1), const),                   # b3
        ],
        out_specs=pl.BlockSpec((ACTION_SIZE, tile_b), lambda i: (0, i)),  # lane-dense out
        compiler_params=pltpu.CompilerParams(
            dimension_semantics=("parallel",)),
        cost_estimate=cost,
    )(x_t, w1_p, b1_p, w2_p, b2_p, w3_p, b3_p)

    out = out[:, :batch] if padded_batch != batch else out
    return out.T                                     # (batch, ACTION_SIZE)


def init_params(key):
    """Deterministic init mirroring nn.Linear's U(-1/sqrt(fan_in), +) scheme."""
    ks = jax.random.split(key, 6)

    def linear(kw, kb, fan_in, fan_out):
        bound = 1.0 / jnp.sqrt(fan_in)
        w = jax.random.uniform(kw, (fan_out, fan_in), jnp.float32, -bound, bound)
        b = jax.random.uniform(kb, (fan_out,), jnp.float32, -bound, bound)
        return w, b

    w1, b1 = linear(ks[0], ks[1], STATE_SIZE, HIDDEN_SIZE)
    w2, b2 = linear(ks[2], ks[3], HIDDEN_SIZE, HIDDEN_SIZE)
    w3, b3 = linear(ks[4], ks[5], HIDDEN_SIZE, ACTION_SIZE)
    return w1, b1, w2, b2, w3, b3


def reference_forward(x, w1, b1, w2, b2, w3, b3, action_max=ACTION_MAX):
    x = jnp.clip(x, -1.1, 1.1)
    h1 = jnp.maximum(x @ w1.T + b1, 0.0)
    h2 = jnp.maximum(h1 @ w2.T + b2, 0.0)
    return jnp.tanh(h2 @ w3.T + b3) * action_max


if __name__ == "__main__":
    key = jax.random.PRNGKey(0)
    k_x, k_p = jax.random.split(key)

    params = init_params(k_p)
    packed = pack_params(*params)          # one-time weight packing (hot path excluded)

    # Small batch (single 128-lane tile, grid=(1,)).
    batch = 8
    x = jax.random.normal(k_x, (batch, STATE_SIZE), jnp.float32) * 1.5  # exercises clamp
    out = jax.block_until_ready(actor_forward(x, *packed))
    ref = reference_forward(x, *params)
    assert out.shape == (batch, ACTION_SIZE), out.shape
    assert jnp.allclose(out, ref, atol=1e-4, rtol=1e-4), (out, ref)

    # Batch not a multiple of 128 (padding path, still grid=(1,)).
    batch2 = 35
    x2 = jax.random.normal(k_x, (batch2, STATE_SIZE), jnp.float32) * 1.5
    out2 = jax.block_until_ready(actor_forward(x2, *packed))
    ref2 = reference_forward(x2, *params)
    assert out2.shape == (batch2, ACTION_SIZE), out2.shape
    assert jnp.allclose(out2, ref2, atol=1e-4, rtol=1e-4), (out2, ref2)

    # Batch > 128: exercises the multi-step (>=2) parallel grid path.
    batch3 = 200
    x3 = jax.random.normal(k_x, (batch3, STATE_SIZE), jnp.float32) * 1.5
    out3 = jax.block_until_ready(actor_forward(x3, *packed))
    ref3 = reference_forward(x3, *params)
    assert out3.shape == (batch3, ACTION_SIZE), out3.shape
    assert jnp.allclose(out3, ref3, atol=1e-4, rtol=1e-4), (out3, ref3)

    print("KERNEL_OK")
</pallas_src>

<mosaic_0001>
module attributes {stable_mosaic.version = 11 : i64} {
  func.func @actor_kernel(%arg0: i32, %arg1: memref<3x128xf32, #tpu.memory_space<vmem>>, %arg2: memref<128x3xf32, #tpu.memory_space<vmem>>, %arg3: memref<128x1xf32, #tpu.memory_space<vmem>>, %arg4: memref<128x128xf32, #tpu.memory_space<vmem>>, %arg5: memref<128x1xf32, #tpu.memory_space<vmem>>, %arg6: memref<1x128xf32, #tpu.memory_space<vmem>>, %arg7: memref<1x1xf32, #tpu.memory_space<vmem>>, %arg8: memref<1x128xf32, #tpu.memory_space<vmem>>) attributes {dimension_semantics = [#tpu.dimension_semantics<parallel>], iteration_bounds = array<i64: 1>, scalar_prefetch = 0 : i64, scratch_operands = 0 : i64, tpu.core_type = #tpu.core_type<tc>, window_params = [{transform_indices = @transform_0, window_bounds = array<i64: 3, 128>}, {pipeline_mode = #tpu.pipeline_mode<synchronous>, transform_indices = @transform_1, window_bounds = array<i64: 128, 3>}, {pipeline_mode = #tpu.pipeline_mode<synchronous>, transform_indices = @transform_2, window_bounds = array<i64: 128, 1>}, {pipeline_mode = #tpu.pipeline_mode<synchronous>, transform_indices = @transform_3, window_bounds = array<i64: 128, 128>}, {pipeline_mode = #tpu.pipeline_mode<synchronous>, transform_indices = @transform_4, window_bounds = array<i64: 128, 1>}, {pipeline_mode = #tpu.pipeline_mode<synchronous>, transform_indices = @transform_5, window_bounds = array<i64: 1, 128>}, {pipeline_mode = #tpu.pipeline_mode<synchronous>, transform_indices = @transform_6, window_bounds = array<i64: 1, 1>}, {transform_indices = @transform_7, window_bounds = array<i64: 1, 128>}]} {
    %c0 = arith.constant 0 : index
    %c0_0 = arith.constant 0 : index
    %0 = vector.load %arg1[%c0, %c0_0] : memref<3x128xf32, #tpu.memory_space<vmem>>, vector<3x128xf32>
    %cst = arith.constant -1.100000e+00 : f32
    %cst_1 = arith.constant 1.100000e+00 : f32
    %1 = vector.broadcast %cst : f32 to vector<3x128xf32>
    %2 = arith.maximumf %1, %0 : vector<3x128xf32>
    %3 = vector.broadcast %cst_1 : f32 to vector<3x128xf32>
    %4 = arith.minimumf %3, %2 : vector<3x128xf32>
    %c0_2 = arith.constant 0 : index
    %c0_3 = arith.constant 0 : index
    %5 = vector.load %arg3[%c0_2, %c0_3] : memref<128x1xf32, #tpu.memory_space<vmem>>, vector<128x1xf32>
    %c0_4 = arith.constant 0 : index
    %c0_5 = arith.constant 0 : index
    %6 = vector.load %arg2[%c0_4, %c0_5] : memref<128x3xf32, #tpu.memory_space<vmem>>, vector<128x1xf32>
    %7 = vector.extract_strided_slice %4 {offsets = [0, 0], sizes = [1, 128], strides = [1, 1]} : vector<3x128xf32> to vector<1x128xf32>
    %8 = vector.broadcast %6 : vector<128x1xf32> to vector<128x128xf32>
    %9 = vector.broadcast %7 : vector<1x128xf32> to vector<128x128xf32>
    %10 = arith.mulf %8, %9 : vector<128x128xf32>
    %11 = vector.broadcast %5 : vector<128x1xf32> to vector<128x128xf32>
    %12 = arith.addf %11, %10 : vector<128x128xf32>
    %c0_6 = arith.constant 0 : index
    %c1 = arith.constant 1 : index
    %13 = vector.load %arg2[%c0_6, %c1] : memref<128x3xf32, #tpu.memory_space<vmem>>, vector<128x1xf32>
    %14 = vector.extract_strided_slice %4 {offsets = [1, 0], sizes = [1, 128], strides = [1, 1]} : vector<3x128xf32> to vector<1x128xf32>
    %15 = vector.broadcast %13 : vector<128x1xf32> to vector<128x128xf32>
    %16 = vector.broadcast %14 : vector<1x128xf32> to vector<128x128xf32>
    %17 = arith.mulf %15, %16 : vector<128x128xf32>
    %18 = arith.addf %12, %17 : vector<128x128xf32>
    %c0_7 = arith.constant 0 : index
    %c2 = arith.constant 2 : index
    %19 = vector.load %arg2[%c0_7, %c2] : memref<128x3xf32, #tpu.memory_space<vmem>>, vector<128x1xf32>
    %20 = vector.extract_strided_slice %4 {offsets = [2, 0], sizes = [1, 128], strides = [1, 1]} : vector<3x128xf32> to vector<1x128xf32>
    %21 = vector.broadcast %19 : vector<128x1xf32> to vector<128x128xf32>
    %22 = vector.broadcast %20 : vector<1x128xf32> to vector<128x128xf32>
    %23 = arith.mulf %21, %22 : vector<128x128xf32>
    %24 = arith.addf %18, %23 : vector<128x128xf32>
    %cst_8 = arith.constant 0.000000e+00 : f32
    %25 = vector.broadcast %cst_8 : f32 to vector<128x128xf32>
    %26 = arith.maximumf %24, %25 : vector<128x128xf32>
    %c0_9 = arith.constant 0 : index
    %c0_10 = arith.constant 0 : index
    %27 = vector.load %arg4[%c0_9, %c0_10] : memref<128x128xf32, #tpu.memory_space<vmem>>, vector<128x128xf32>
    %cst_11 = arith.constant dense<0.000000e+00> : vector<128x128xf32>
    %28 = tpu.matmul %27, %26, %cst_11 {dimension_numbers = #tpu.dot_dimension_numbers<[1], [0], [0], [1], [0, 0, 1, 1], [], []>} : vector<128x128xf32>, vector<128x128xf32>, vector<128x128xf32> -> vector<128x128xf32>
    %c0_12 = arith.constant 0 : index
    %c0_13 = arith.constant 0 : index
    %29 = vector.load %arg5[%c0_12, %c0_13] : memref<128x1xf32, #tpu.memory_space<vmem>>, vector<128x1xf32>
    %30 = vector.broadcast %29 : vector<128x1xf32> to vector<128x128xf32>
    %31 = arith.addf %28, %30 : vector<128x128xf32>
    %cst_14 = arith.constant 0.000000e+00 : f32
    %32 = vector.broadcast %cst_14 : f32 to vector<128x128xf32>
    %33 = arith.maximumf %31, %32 : vector<128x128xf32>
    %c0_15 = arith.constant 0 : index
    %c0_16 = arith.constant 0 : index
    %34 = vector.load %arg6[%c0_15, %c0_16] : memref<1x128xf32, #tpu.memory_space<vmem>>, vector<1x128xf32>
    %cst_17 = arith.constant dense<0.000000e+00> : vector<1x128xf32>
    %35 = tpu.matmul %34, %33, %cst_17 {dimension_numbers = #tpu.dot_dimension_numbers<[1], [0], [0], [1], [0, 0, 1, 1], [], []>} : vector<1x128xf32>, vector<128x128xf32>, vector<1x128xf32> -> vector<1x128xf32>
    %c0_18 = arith.constant 0 : index
    %c0_19 = arith.constant 0 : index
    %36 = vector.load %arg7[%c0_18, %c0_19] : memref<1x1xf32, #tpu.memory_space<vmem>>, vector<1x1xf32>
    %37 = vector.broadcast %36 : vector<1x1xf32> to vector<1x128xf32>
    %38 = arith.addf %35, %37 : vector<1x128xf32>
    %39 = math.tanh %38 : vector<1x128xf32>
    %cst_20 = arith.constant 2.000000e+00 : f32
    %40 = vector.broadcast %cst_20 : f32 to vector<1x128xf32>
    %41 = arith.mulf %39, %40 : vector<1x128xf32>
    %c0_21 = arith.constant 0 : index
    %c0_22 = arith.constant 0 : index
    %42 = vector.load %arg8[%c0_21, %c0_22] : memref<1x128xf32, #tpu.memory_space<vmem>>, vector<1x128xf32>
    tpu.vector_store %arg8[%c0_21, %c0_22], %41 {strides = array<i32>} : memref<1x128xf32, #tpu.memory_space<vmem>>, vector<1x128xf32>,
    return
  }
  func.func @transform_0(%arg0: i32) -> (i32, i32) {
    %c0_i32 = arith.constant 0 : i32
    %c0_i32_0 = arith.constant 0 : i32
    return %c0_i32, %arg0 : i32, i32
  }
  func.func @transform_1(%arg0: i32) -> (i32, i32) {
    %c0_i32 = arith.constant 0 : i32
    %c0_i32_0 = arith.constant 0 : i32
    %c0_i32_1 = arith.constant 0 : i32
    return %c0_i32, %c0_i32_0 : i32, i32
  }
  func.func @transform_2(%arg0: i32) -> (i32, i32) {
    %c0_i32 = arith.constant 0 : i32
    %c0_i32_0 = arith.constant 0 : i32
    %c0_i32_1 = arith.constant 0 : i32
    return %c0_i32, %c0_i32_0 : i32, i32
  }
  func.func @transform_3(%arg0: i32) -> (i32, i32) {
    %c0_i32 = arith.constant 0 : i32
    %c0_i32_0 = arith.constant 0 : i32
    %c0_i32_1 = arith.constant 0 : i32
    return %c0_i32, %c0_i32_0 : i32, i32
  }
  func.func @transform_4(%arg0: i32) -> (i32, i32) {
    %c0_i32 = arith.constant 0 : i32
    %c0_i32_0 = arith.constant 0 : i32
    %c0_i32_1 = arith.constant 0 : i32
    return %c0_i32, %c0_i32_0 : i32, i32
  }
  func.func @transform_5(%arg0: i32) -> (i32, i32) {
    %c0_i32 = arith.constant 0 : i32
    %c0_i32_0 = arith.constant 0 : i32
    %c0_i32_1 = arith.constant 0 : i32
    return %c0_i32, %c0_i32_0 : i32, i32
  }
  func.func @transform_6(%arg0: i32) -> (i32, i32) {
    %c0_i32 = arith.constant 0 : i32
    %c0_i32_0 = arith.constant 0 : i32
    %c0_i32_1 = arith.constant 0 : i32
    return %c0_i32, %c0_i32_0 : i32, i32
  }
  func.func @transform_7(%arg0: i32) -> (i32, i32) {
    %c0_i32 = arith.constant 0 : i32
    %c0_i32_0 = arith.constant 0 : i32
    return %c0_i32, %arg0 : i32, i32
  }
}

</mosaic_0001>

<bundles_post_ra>
// kernel: actor_forward.1
= control target key start
LH: loop header
LB: loop body
LE: loop exit
PB: predicated region body
PF: predicated region fallthrough
CT: control target
= control target key end

     0   :  { %v1077_v0 = vmov 0   ;;  %v1078_v6 = vmov 1   ;;  %v1079_v11 = vmov 2   ;;  %v143_v57 = vlaneseq  ;;  %s1523_s2 = inlined_call_operand.vmem [shape: f32[128,1], index: 2, kind: input, shape index: {}]   ;;  %s1524_s1 = inlined_call_operand.vmem [shape: f32[128,3], index: 1, kind: input, shape index: {}]   ;;  %s1525_s0 = inlined_call_operand.vmem [shape: f32[3,128], index: 0, kind: input, shape index: {}]   ;;  %s1526_s3 = inlined_call_operand.vmem [shape: f32[128,128], index: 3, kind: input, shape index: {}]   ;;  %s1527_s4 = inlined_call_operand.vmem [shape: f32[128,1], index: 4, kind: input, shape index: {}]   ;;  %s1528_s6 = inlined_call_operand.<no memory space> [shape: f32[1,1], index: 6, kind: input, shape index: {}]   ;;  %s1529_s5 = inlined_call_operand.vmem [shape: f32[1,128], index: 5, kind: input, shape index: {}]   ;;  %s1530_s7 = inlined_call_operand.vmem [shape: f32[1,128], index: 7, kind: output, shape index: {}]  }
   0x1   :  { %1040 = vset.pattern.permute.xlu1 %v1077_v0  ;;  %1039 = vset.pattern.permute.xlu0 %v1077_v0  ;;  %v31_v1 = vld [vmem:[%s1523_s2] sm:$0xff]  ;;  %v32_v3 = vld [vmem:[%s1523_s2 + $0x8] sm:$0xff]  ;;  %v50_v5 = vld [vmem:[%s1524_s1 + $0x18] sm:$0xff]  ;;  %vm1081_vm0 = vmmov 0  }
   0x2   :  { %v1131_v2 = vld [vmem:[%s1524_s1] sm:$0xff]  ;;  %165 = vperm.xlu1 %1040, %v31_v1   ;;  %v48_v4 = vld [vmem:[%s1524_s1 + $0x8] sm:$0xff]  ;;  %v33_v7 = vld [vmem:[%s1523_s2 + $0x10] sm:$0xff]  ;;  %v1315_v60 = vshrl.u32 %v143_v57, 7 }
   0x3   :  { %65 = vperm.xlu0 %1039, %v1131_v2   ;;  %v49_v8 = vld [vmem:[%s1524_s1 + $0x10] sm:$0xff]  ;;  %v52_v9 = vld [vmem:[%s1524_s1 + $0x28] sm:$0xff]  ;;  %v35_v10 = vld [vmem:[%s1523_s2 + $0x20] sm:$0xff] }
   0x4   :  { %v1162_v12 = vld [vmem:[%s1524_s1 + $0x38] sm:$0xff]  ;;  %v37_v14 = vld [vmem:[%s1523_s2 + $0x30] sm:$0xff]  ;;  %v1175_v15 = vld [vmem:[%s1524_s1 + $0x48] sm:$0xff]  ;;  %v145_v1 = vsub.s32 0, %v1315_v60 }
   0x5   :  { %v34_v13 = vld [vmem:[%s1523_s2 + $0x18] sm:$0xff]  ;;  %v39_v16 = vld [vmem:[%s1523_s2 + $0x40] sm:$0xff]  ;;  %v41_v19 = vld [vmem:[%s1523_s2 + $0x50] sm:$0xff] }
   0x6   :  { %170 = vperm.xlu1 %1040, %v32_v3   ;;  %v51_v17 = vld [vmem:[%s1524_s1 + $0x20] sm:$0xff]  ;;  %v1189_v18 = vld [vmem:[%s1524_s1 + $0x58] sm:$0xff]  ;;  %v1199_v20 = vld [vmem:[%s1524_s1 + $0x68] sm:$0xff]  ;;  %v325_v3 = vsub.s32 1, %v1315_v60 }
   0x7   :  { %70 = vperm.xlu0 %1039, %v48_v4   ;;  %v36_v21 = vld [vmem:[%s1523_s2 + $0x28] sm:$0xff]  ;;  %v43_v22 = vld [vmem:[%s1523_s2 + $0x60] sm:$0xff]  ;;  %v1212_v23 = vld [vmem:[%s1524_s1 + $0x78] sm:$0xff] }
   0x8   :  { %v45_v24 = vld [vmem:[%s1523_s2 + $0x70] sm:$0xff]  ;;  %v38_v26 = vld [vmem:[%s1523_s2 + $0x38] sm:$0xff]  ;;  %v55_v27 = vld [vmem:[%s1524_s1 + $0x40] sm:$0xff] }
   0x9   :  { %v53_v25 = vld [vmem:[%s1524_s1 + $0x30] sm:$0xff]  ;;  %v59_v29 = vld [vmem:[%s1524_s1 + $0x60] sm:$0xff]  ;;  %v40_v31 = vld [vmem:[%s1523_s2 + $0x48] sm:$0xff] }
   0xa   :  { %1041 = vset.pattern.permute.xlu1 %v1078_v6  ;;  %v57_v28 = vld [vmem:[%s1524_s1 + $0x50] sm:$0xff]  ;;  %v42_v32 = vld [vmem:[%s1523_s2 + $0x58] sm:$0xff]  ;;  %v44_v42 = vld [vmem:[%s1523_s2 + $0x68] sm:$0xff] }
   0xb   :  { %80 = vperm.xlu0 %1039, %v50_v5   ;;  %264 = vperm.xlu1 %1041, %v48_v4   ;;  %v1246_v30 = vld [vmem:[%s1524_s1 + $0x70] sm:$0xff]  ;;  %v46_v54 = vld [vmem:[%s1523_s2 + $0x78] sm:$0xff]  ;;  %v28_v61 = vld [vmem:[%s1525_s0] sm:$0x7] }
   0xf   :  { %175 = vperm.xlu0 %1039, %v33_v7   ;;  %1042 = vset.pattern.permute.xlu1 %v1077_v0  ;;  %v425_v7 = vsub.s32 2, %v1315_v60 }
  0x10   :  { %75 = vperm.xlu1 %1042, %v49_v8  }
  0x13   :  { %90 = vperm.xlu0 %1039, %v52_v9  }
  0x14   :  { %1043 = vset.pattern.permute.xlu1 %v1079_v11 }
  0x15   :  { %360 = vperm.xlu1 %1043, %v1131_v2  }
  0x17   :  { %185 = vperm.xlu0 %1039, %v35_v10  }
  0x19   :  { %364 = vperm.xlu1 %1043, %v48_v4  }
  0x1b   :  { %100 = vperm.xlu0 %1039, %v1162_v12  }
  0x1d   :  { %1044 = vset.pattern.permute.xlu1 %v1077_v0 }
  0x1e   :  { %180 = vperm.xlu1 %1044, %v34_v13  }
  0x1f   :  { %195 = vperm.xlu0 %1039, %v37_v14  }
  0x22   :  { %1045 = vset.pattern.permute.xlu1 %v1078_v6 }
  0x23   :  { %110 = vperm.xlu0 %1039, %v1175_v15   ;;  %272 = vperm.xlu1 %1045, %v50_v5  }
  0x27   :  { %205 = vperm.xlu0 %1039, %v39_v16   ;;  %1046 = vset.pattern.permute.xlu1 %v1077_v0 }
  0x28   :  { %85 = vperm.xlu1 %1046, %v51_v17  }
  0x2b   :  { %120 = vperm.xlu0 %1039, %v1189_v18  }
  0x2c   :  { %1047 = vset.pattern.permute.xlu1 %v1079_v11 }
  0x2d   :  { %368 = vperm.xlu1 %1047, %v49_v8  }
  0x2f   :  { %215 = vperm.xlu0 %1039, %v41_v19  }
  0x31   :  { %372 = vperm.xlu1 %1047, %v50_v5  }
  0x33   :  { %130 = vperm.xlu0 %1039, %v1199_v20  }
  0x35   :  { %1048 = vset.pattern.permute.xlu1 %v1077_v0 }
  0x36   :  { %190 = vperm.xlu1 %1048, %v36_v21  }
  0x37   :  { %225 = vperm.xlu0 %1039, %v43_v22  }
  0x3a   :  { %1049 = vset.pattern.permute.xlu1 %v1078_v6 }
  0x3b   :  { %140 = vperm.xlu0 %1039, %v1212_v23   ;;  %280 = vperm.xlu1 %1049, %v52_v9  }
  0x3f   :  { %235 = vperm.xlu0 %1039, %v45_v24   ;;  %1050 = vset.pattern.permute.xlu1 %v1077_v0 }
  0x40   :  { %95 = vperm.xlu1 %1050, %v53_v25  }
  0x43   :  { %1068 = vset.pattern.permute.xlu0 %v1078_v6 }
  0x44   :  { %260 = vperm.xlu0 %1068, %v1131_v2   ;;  %1051 = vset.pattern.permute.xlu1 %v1079_v11  ;;  %v836_v2 = vclamps-f32 %v28_v61, 1.1 }
  0x45   :  { %376 = vperm.xlu1 %1051, %v51_v17  }
  0x46   :  { %v1332_v5 = vrot.slane %v836_v2, %v145_v1 }
  0x48   :  { %268 = vperm.xlu0 %1068, %v49_v8  }
  0x49   :  { %380 = vperm.xlu1 %1051, %v52_v9  }
  0x4c   :  { %276 = vperm.xlu0 %1068, %v51_v17  }
  0x4d   :  { %1052 = vset.pattern.permute.xlu1 %v1077_v0 }
  0x4e   :  { %200 = vperm.xlu1 %1052, %v38_v26  }
  0x50   :  { %284 = vperm.xlu0 %1068, %v53_v25  }
  0x52   :  { %1053 = vset.pattern.permute.xlu1 %v1078_v6 }
  0x53   :  { %288 = vperm.xlu1 %1053, %v1162_v12  }
  0x54   :  { %292 = vperm.xlu0 %1068, %v55_v27  }
  0x57   :  { %1054 = vset.pattern.permute.xlu1 %v1077_v0 }
  0x58   :  { %300 = vperm.xlu0 %1068, %v57_v28   ;;  %105 = vperm.xlu1 %1054, %v55_v27  }
  0x5c   :  { %308 = vperm.xlu0 %1068, %v59_v29   ;;  %1055 = vset.pattern.permute.xlu1 %v1079_v11 }
  0x5d   :  { %384 = vperm.xlu1 %1055, %v53_v25  }
  0x60   :  { %316 = vperm.xlu0 %1068, %v1246_v30  }
  0x61   :  { %388 = vperm.xlu1 %1055, %v1162_v12   ;;  %v1342_v12 = vrot.slane %v836_v2, %v425_v7 }
  0x64   :  { %1072 = vset.pattern.permute.xlu0 %v1079_v11 }
  0x65   :  { %420 = vperm.xlu0 %1072, %v1212_v23   ;;  %1056 = vset.pattern.permute.xlu1 %v1077_v0 }
  0x66   :  { %210 = vperm.xlu1 %1056, %v40_v31  }
  0x69   :  { %1074 = vset.pattern.permute.xlu0 %v1077_v0 }
  0x6a   :  { %1057 = vset.pattern.permute.xlu1 %v1078_v6 }
  0x6b   :  { %296 = vperm.xlu1 %1057, %v1175_v15  }
  0x6f   :  { %1058 = vset.pattern.permute.xlu1 %v1077_v0 }
  0x70   :  { %115 = vperm.xlu1 %1058, %v57_v28  }
  0x74   :  { %1059 = vset.pattern.permute.xlu1 %v1079_v11 }
  0x75   :  { %392 = vperm.xlu1 %1059, %v55_v27  }
  0x79   :  { %396 = vperm.xlu1 %1059, %v1175_v15  }
  0x7d   :  { %1060 = vset.pattern.permute.xlu1 %v1077_v0 }
  0x7e   :  { %220 = vperm.xlu1 %1060, %v42_v32  }
  0x81   :  { %v1266_v33 = vpop.permute.xlu1 %165 }
  0x82   :  { %v1268_v34 = vpop.permute.xlu0 %65  ;;  %1061 = vset.pattern.permute.xlu1 %v1078_v6 }
  0x83   :  { %304 = vperm.xlu1 %1061, %v1189_v18   ;;  %v147_v13 = vmul.f32 %v1332_v5, %v1268_v34 }
  0x85   :  { %v1272_v35 = vpop.permute.xlu1 %170  ;;  %v243_v21 = vadd.f32 %v1266_v33, %v147_v13 }
  0x86   :  { %v71_v36 = vpop.permute.xlu0 %70 }
  0x87   :  { %1062 = vset.pattern.permute.xlu1 %v1077_v0  ;;  %v148_v9 = vmul.f32 %v1332_v5, %v71_v36 }
  0x88   :  { %125 = vperm.xlu1 %1062, %v59_v29  }
  0x89   :  { %v244_v15 = vadd.f32 %v1272_v35, %v148_v9 }
  0x8a   :  { %v81_v37 = vpop.permute.xlu0 %80  ;;  %v265_v38 = vpop.permute.xlu1 %264 }
  0x8b   :  { %v150_v16 = vmul.f32 %v1332_v5, %v81_v37 }
  0x8c   :  { %1063 = vset.pattern.permute.xlu1 %v1079_v11 }
  0x8d   :  { %400 = vperm.xlu1 %1063, %v57_v28  }
  0x8e   :  { %v1276_v39 = vpop.permute.xlu0 %175 }
  0x8f   :  { %v1278_v40 = vpop.permute.xlu1 %75 }
  0x90   :  { %v149_v22 = vmul.f32 %v1332_v5, %v1278_v40 }
  0x91   :  { %404 = vperm.xlu1 %1063, %v1189_v18  }
  0x92   :  { %v1281_v41 = vpop.permute.xlu0 %90  ;;  %v245_v34 = vadd.f32 %v1276_v39, %v149_v22 }
  0x93   :  { %v152_v28 = vmul.f32 %v1332_v5, %v1281_v41 }
  0x94   :  { %v1286_v43 = vpop.permute.xlu1 %360 }
  0x95   :  { %1064 = vset.pattern.permute.xlu1 %v1077_v0 }
  0x96   :  { %v1289_v44 = vpop.permute.xlu0 %185  ;;  %230 = vperm.xlu1 %1064, %v44_v42  }
  0x98   :  { %v365_v45 = vpop.permute.xlu1 %364 }
  0x99   :  { %v428_v17 = vmul.f32 %v1342_v12, %v365_v45 }
  0x9a   :  { %v1291_v46 = vpop.permute.xlu0 %100  ;;  %1065 = vset.pattern.permute.xlu1 %v1078_v6 }
  0x9b   :  { %312 = vperm.xlu1 %1065, %v1199_v20  }
  0x9d   :  { %v181_v47 = vpop.permute.xlu1 %180 }
  0x9e   :  { %v1295_v48 = vpop.permute.xlu0 %195  ;;  %v246_v25 = vadd.f32 %v181_v47, %v150_v16 }
  0x9f   :  { %1066 = vset.pattern.permute.xlu1 %v1077_v0 }
  0xa0   :  { %135 = vperm.xlu1 %1066, %v1246_v30  }
  0xa2   :  { %v1299_v49 = vpop.permute.xlu0 %110  ;;  %v273_v50 = vpop.permute.xlu1 %272 }
  0xa4   :  { %1067 = vset.pattern.permute.xlu1 %v1079_v11 }
  0xa5   :  { %408 = vperm.xlu1 %1067, %v59_v29   ;;  %v427_v29 = vmul.f32 %v1342_v12, %v1286_v43 }
  0xa6   :  { %v1302_v51 = vpop.permute.xlu0 %205 }
  0xa7   :  { %v86_v52 = vpop.permute.xlu1 %85 }
  0xa8   :  { %v151_v32 = vmul.f32 %v1332_v5, %v86_v52 }
  0xa9   :  { %412 = vperm.xlu1 %1067, %v1199_v20   ;;  %v475_v20 = vld [vmem:[%s1526_s3] sm:$0xff] }
  0xaa   :  { %v1305_v53 = vpop.permute.xlu0 %120  ;;  %918 = vmatprep.mubr.f32.mxu0 %v475_v20  ;;  %v247_v52 = vadd.f32 %v1289_v44, %v151_v32  ;;  %v493_v32 = vld [vmem:[%s1527_s4 + $0x10] sm:$0xff] }
  0xab   :  { %519 = vperm.xlu0 %1074, %v493_v32  }
  0xac   :  { %v369_v55 = vpop.permute.xlu1 %368 }
  0xad   :  { %1069 = vset.pattern.permute.xlu1 %v1077_v0  ;;  %v429_v40 = vmul.f32 %v1342_v12, %v369_v55 }
  0xae   :  { %v1311_v56 = vpop.permute.xlu0 %215  ;;  %240 = vperm.xlu1 %1069, %v46_v54  }
  0xb0   :  { %v373_v58 = vpop.permute.xlu1 %372 }
  0xb1   :  { %v430_v26 = vmul.f32 %v1342_v12, %v373_v58 }
  0xb2   :  { %v1313_v59 = vpop.permute.xlu0 %130  ;;  %1070 = vset.pattern.permute.xlu1 %v1078_v6  ;;  %v1334_v6 = vrot.slane %v836_v2, %v325_v3 }
  0xb3   :  { %320 = vperm.xlu1 %1070, %v1212_v23  }
  0xb4   :  { %v330_v19 = vmul.f32 %v1334_v6, %v273_v50 }
  0xb5   :  { %v191_v62 = vpop.permute.xlu1 %190 }
  0xb6   :  { %v1322_v63 = vpop.permute.xlu0 %225  ;;  %v346_v31 = vadd.f32 %v330_v19, %v246_v25  ;;  %v248_v45 = vadd.f32 %v191_v62, %v152_v28 }
  0xb7   :  { %1071 = vset.pattern.permute.xlu1 %v1079_v11  ;;  %v328_v11 = vmul.f32 %v1334_v6, %v265_v38 }
  0xb8   :  { %416 = vperm.xlu1 %1071, %v1246_v30   ;;  %v446_v42 = vadd.f32 %v430_v26, %v346_v31  ;;  %v492_v31 = vld [vmem:[%s1527_s4 + $0x8] sm:$0xff] }
  0xb9   :  { %v344_v18 = vadd.f32 %v328_v11, %v244_v15 }
  0xba   :  { %v1328_v4 = vpop.permute.xlu0 %140  ;;  %v281_v8 = vpop.permute.xlu1 %280  ;;  %v462_v2 = vmax.f32 %v446_v42, 0.0 }
  0xbb   :  { %v444_v24 = vadd.f32 %v428_v17, %v344_v18  ;;  %v332_v35 = vmul.f32 %v1334_v6, %v281_v8 }
  0xbc   :  { %1073 = vset.pattern.permute.xlu1 %v1077_v0 }
  0xbd   :  { %v460_v38 = vmax.f32 %v444_v24, 0.0  ;;  %v348_v57 = vadd.f32 %v332_v35, %v248_v45  ;;  %v500_v45 = vld [vmem:[%s1527_s4 + $0x48] sm:$0xff] }
  0xbe   :  { %v1339_v10 = vpop.permute.xlu0 %235 }
  0xbf   :  { %v96_v14 = vpop.permute.xlu1 %95 }
  0xc0   :  { %v153_v19 = vmul.f32 %v1332_v5, %v96_v14  ;;  %v12_v14 = vstv %s1528_s6 }
  0xc1   :  { %13 = vst [vmem:[#allocation2] sm:$0x1] %v12_v14 }
  0xc2   :  { %v249_v22 = vadd.f32 %v1295_v48, %v153_v19 }
  0xc3   :  { %v261_v0 = vpop.permute.xlu0 %260 }
  0xc4   :  { %v327_v23 = vmul.f32 %v1334_v6, %v261_v0  ;;  %v377_v27 = vpop.permute.xlu1 %376  ;;  %v154_v0 = vmul.f32 %v1332_v5, %v1291_v46  ;;  %v491_v46 = vld [vmem:[%s1527_s4] sm:$0xff] }
  0xc5   :  { %v431_v3 = vmul.f32 %v1342_v12, %v377_v27  ;;  %509 = vperm.xlu1 %1073, %v491_v46  }
  0xc6   :  { %v343_v30 = vadd.f32 %v327_v23, %v243_v21 }
  0xc7   :  { %v269_v33 = vpop.permute.xlu0 %268 }
  0xc8   :  { %v329_v36 = vmul.f32 %v1334_v6, %v269_v33  ;;  %v443_v37 = vadd.f32 %v427_v29, %v343_v30  ;;  %v381_v41 = vpop.permute.xlu1 %380 }
  0xc9   :  { %v432_v43 = vmul.f32 %v1342_v12, %v381_v41  ;;  %514 = vperm.xlu1 %1073, %v492_v31   ;;  %v495_v41 = vld [vmem:[%s1527_s4 + $0x20] sm:$0xff] }
  0xca   :  { %v345_v47 = vadd.f32 %v329_v36, %v245_v34  ;;  %v459_v50 = vmax.f32 %v443_v37, 0.0  ;;  %v496_v36 = vld [vmem:[%s1527_s4 + $0x28] sm:$0xff] }
  0xcb   :  { %v277_v54 = vpop.permute.xlu0 %276  ;;  %v448_v55 = vadd.f32 %v432_v43, %v348_v57  ;;  %534 = vperm.xlu0 %1074, %v496_v36  }
  0xcc   :  { %v445_v39 = vadd.f32 %v429_v40, %v345_v47  ;;  %v331_v58 = vmul.f32 %v1334_v6, %v277_v54  ;;  %v977_v61 = vpack.c.bf16 %v460_v38, %v459_v50  ;;  %v494_v38 = vld [vmem:[%s1527_s4 + $0x18] sm:$0xff]  ;;  %v497_v50 = vld [vmem:[%s1527_s4 + $0x30] sm:$0xff] }
  0xcd   :  { %v201_v9 = vpop.permute.xlu1 %200  ;;  %v464_v13 = vmax.f32 %v448_v55, 0.0  ;;  %v498_v40 = vld [vmem:[%s1527_s4 + $0x38] sm:$0xff]  ;;  %524 = vperm.xlu1 %1073, %v494_v38   ;;  %v504_v55 = vld [vmem:[%s1527_s4 + $0x68] sm:$0xff] }
  0xce   :  { %v461_v7 = vmax.f32 %v445_v39, 0.0  ;;  %v347_v8 = vadd.f32 %v331_v58, %v247_v52  ;;  %978 = vmatprep.subr.bf16.mxu0 %v977_v61  ;;  %v250_v25 = vadd.f32 %v201_v9, %v154_v0  ;;  %v502_v54 = vld [vmem:[%s1527_s4 + $0x58] sm:$0xff]  ;;  %v499_v58 = vld [vmem:[%s1527_s4 + $0x40] sm:$0xff]  ;;  %v501_v9 = vld [vmem:[%s1527_s4 + $0x50] sm:$0xff] }
  0xcf   :  { %980 = vmatpush3.bf16.msra.mxu0 %v977_v61  ;;  %v285_v18 = vpop.permute.xlu0 %284  ;;  %544 = vperm.xlu0 %1074, %v498_v40  }
  0xd0   :  { %v447_v62 = vadd.f32 %v431_v3, %v347_v8  ;;  %v981_v11 = vpack.c.bf16 %v462_v2, %v461_v7  ;;  %v333_v20 = vmul.f32 %v1334_v6, %v285_v18  ;;  %v156_v2 = vmul.f32 %v1332_v5, %v1299_v49 }
  0xd1   :  { %529 = vperm.xlu1 %1073, %v495_v41  }
  0xd2   :  { %v463_v15 = vmax.f32 %v447_v62, 0.0  ;;  %982 = vmatprep.subr.bf16.mxu0 %v981_v11  ;;  %v289_v44 = vpop.permute.xlu1 %288  ;;  %v349_v26 = vadd.f32 %v333_v20, %v249_v22  ;;  %v505_v20 = vld [vmem:[%s1527_s4 + $0x70] sm:$0xff]  ;;  %v749_v22 = vld [vmem:[#allocation2] sm:$0x1] }
  0xd3   :  { %984 = vmatpush3.bf16.msra.mxu0 %v981_v11  ;;  %v334_v23 = vmul.f32 %v1334_v6, %v289_v44  ;;  %v293_v52 = vpop.permute.xlu0 %292  ;;  %554 = vperm.xlu0 %1074, %v500_v45  }
  0xd4   :  { %v985_v16 = vpack.c.bf16 %v464_v13, %v463_v15  ;;  %v335_v39 = vmul.f32 %v1334_v6, %v293_v52  ;;  %v506_v15 = vld [vmem:[%s1527_s4 + $0x78] sm:$0xff] }
  0xd5   :  { %v350_v28 = vadd.f32 %v334_v23, %v250_v25  ;;  %539 = vperm.xlu1 %1073, %v497_v50   ;;  %v160_v50 = vmul.f32 %v1332_v5, %v1313_v59  ;;  %v162_v59 = vmul.f32 %v1332_v5, %v1328_v4 }
  0xd6   :  { %986 = vmatprep.subr.bf16.mxu0 %v985_v16 }
  0xd7   :  { %988 = vmatpush3.bf16.msra.mxu0 %v985_v16  ;;  %v106_v17 = vpop.permute.xlu1 %105  ;;  %564 = vperm.xlu0 %1074, %v502_v54   ;;  %v503_v16 = vld [vmem:[%s1527_s4 + $0x60] sm:$0xff]  ;;  %v301_v25 = vpop.permute.xlu0 %300 }
  0xd8   :  { %v155_v47 = vmul.f32 %v1332_v5, %v106_v17 }
  0xd9   :  { %549 = vperm.xlu1 %1073, %v499_v58  }
  0xda   :  { %v251_v57 = vadd.f32 %v1302_v51, %v155_v47 }
  0xdb   :  { %574 = vperm.xlu0 %1074, %v504_v55   ;;  %v309_v41 = vpop.permute.xlu0 %308 }
  0xdc   :  { %v385_v21 = vpop.permute.xlu1 %384  ;;  %v351_v51 = vadd.f32 %v335_v39, %v251_v57  ;;  %v339_v47 = vmul.f32 %v1334_v6, %v309_v41 }
  0xdd   :  { %v433_v24 = vmul.f32 %v1342_v12, %v385_v21  ;;  %559 = vperm.xlu1 %1073, %v501_v9  }
  0xdf   :  { %v449_v29 = vadd.f32 %v433_v24, %v349_v26  ;;  %584 = vperm.xlu0 %1074, %v506_v15   ;;  %v317_v55 = vpop.permute.xlu0 %316 }
  0xe0   :  { %v389_v27 = vpop.permute.xlu1 %388 }
  0xe1   :  { %v434_v30 = vmul.f32 %v1342_v12, %v389_v27  ;;  %v465_v33 = vmax.f32 %v449_v29, 0.0  ;;  %569 = vperm.xlu1 %1073, %v503_v16   ;;  %v337_v27 = vmul.f32 %v1334_v6, %v301_v25  ;;  %v158_v29 = vmul.f32 %v1332_v5, %v1305_v53  ;;  %v480_v25 = vld [vmem:[%s1526_s3 + $0x28] sm:$0xff] }
  0xe3   :  { %v450_v48 = vadd.f32 %v434_v30, %v350_v28 }
  0xe5   :  { %v466_v34 = vmax.f32 %v450_v48, 0.0  ;;  %v211_v35 = vpop.permute.xlu1 %210  ;;  %579 = vperm.xlu1 %1073, %v505_v20  }
  0xe6   :  { %v252_v8 = vadd.f32 %v211_v35, %v156_v2 }
  0xe7   :  { %v989_v37 = vpack.c.bf16 %v466_v34, %v465_v33 }
  0xe9   :  { %990 = vmatprep.subr.bf16.mxu0 %v989_v37  ;;  %752 = vperm.xlu1 %1073, %v749_v22  }
  0xea   :  { %v297_v42 = vpop.permute.xlu1 %296  ;;  %992 = vmatpush3.bf16.msra.mxu0 %v989_v37 }
  0xeb   :  { %v336_v3 = vmul.f32 %v1334_v6, %v297_v42 }
  0xed   :  { %v352_v11 = vadd.f32 %v336_v3, %v252_v8 }
  0xef   :  { %v116_v43 = vpop.permute.xlu1 %115 }
  0xf0   :  { %v157_v23 = vmul.f32 %v1332_v5, %v116_v43 }
  0xf2   :  { %v253_v26 = vadd.f32 %v1311_v56, %v157_v23 }
  0xf4   :  { %v393_v61 = vpop.permute.xlu1 %392  ;;  %v353_v14 = vadd.f32 %v337_v27, %v253_v26  ;;  %v481_v26 = vld [vmem:[%s1526_s3 + $0x30] sm:$0xff]  ;;  %v482_v27 = vld [vmem:[%s1526_s3 + $0x38] sm:$0xff] }
  0xf5   :  { %v435_v7 = vmul.f32 %v1342_v12, %v393_v61 }
  0xf7   :  { %v451_v13 = vadd.f32 %v435_v7, %v351_v51 }
  0xf8   :  { %v397_v62 = vpop.permute.xlu1 %396 }
  0xf9   :  { %v436_v49 = vmul.f32 %v1342_v12, %v397_v62  ;;  %v467_v17 = vmax.f32 %v451_v13, 0.0 }
  0xfb   :  { %v452_v44 = vadd.f32 %v436_v49, %v352_v11  ;;  %v421_v11 = vpop.permute.xlu0 %420 }
  0xfc   :  { %v442_v16 = vmul.f32 %v1342_v12, %v421_v11 }
  0xfd   :  { %v468_v18 = vmax.f32 %v452_v44, 0.0  ;;  %v221_v19 = vpop.permute.xlu1 %220 }
  0xfe   :  { %v254_v48 = vadd.f32 %v221_v19, %v158_v29  ;;  %v484_v29 = vld [vmem:[%s1526_s3 + $0x48] sm:$0xff] }
  0xff   :  { %v993_v0 = vpack.c.bf16 %v468_v18, %v467_v17  ;;  %v341_v18 = vmul.f32 %v1334_v6, %v317_v55 }
 0x101   :  { %994 = vmatprep.subr.bf16.mxu0 %v993_v0 }
 0x102   :  { %v305_v21 = vpop.permute.xlu1 %304  ;;  %996 = vmatpush3.bf16.msra.mxu0 %v993_v0 }
 0x103   :  { %v338_v30 = vmul.f32 %v1334_v6, %v305_v21 }
 0x105   :  { %v354_v32 = vadd.f32 %v338_v30, %v254_v48  ;;  %v485_v30 = vld [vmem:[%s1526_s3 + $0x50] sm:$0xff]  ;;  %v488_v48 = vld [vmem:[%s1526_s3 + $0x68] sm:$0xff] }
 0x107   :  { %v126_v24 = vpop.permute.xlu1 %125 }
 0x108   :  { %v159_v53 = vmul.f32 %v1332_v5, %v126_v24  ;;  %v477_v24 = vld [vmem:[%s1526_s3 + $0x10] sm:$0xff] }
 0x10a   :  { %v255_v45 = vadd.f32 %v1322_v63, %v159_v53 }
 0x10c   :  { %v401_v28 = vpop.permute.xlu1 %400  ;;  %v355_v57 = vadd.f32 %v339_v47, %v255_v45 }
 0x10d   :  { %v437_v46 = vmul.f32 %v1342_v12, %v401_v28  ;;  %v483_v28 = vld [vmem:[%s1526_s3 + $0x40] sm:$0xff] }
 0x10f   :  { %v453_v33 = vadd.f32 %v437_v46, %v353_v14  ;;  %v486_v46 = vld [vmem:[%s1526_s3 + $0x58] sm:$0xff]  ;;  %v487_v14 = vld [vmem:[%s1526_s3 + $0x60] sm:$0xff] }
 0x110   :  { %v405_v31 = vpop.permute.xlu1 %404 }
 0x111   :  { %v438_v34 = vmul.f32 %v1342_v12, %v405_v31  ;;  %v469_v36 = vmax.f32 %v453_v33, 0.0  ;;  %v489_v31 = vld [vmem:[%s1526_s3 + $0x70] sm:$0xff]  ;;  %v1080_v33 = vmov 0.0|0.0  }
 0x112   :  { %1009 = vmatprep.subr.bf16.mxu1 %v1080_v33 }
 0x113   :  { %v454_v35 = vadd.f32 %v438_v34, %v354_v32  ;;  %v490_v32 = vld [vmem:[%s1526_s3 + $0x78] sm:$0xff]  ;;  %v1082_v34 = vmov 0.0  }
 0x114   :  { %974 = vmatprep.mubr.msk.f32.mxu1 %vm1081_vm0, %v1082_v34 }
 0x115   :  { %v470_v56 = vmax.f32 %v454_v35, 0.0  ;;  %v231_v37 = vpop.permute.xlu1 %230 }
 0x116   :  { %v256_v39 = vadd.f32 %v231_v37, %v160_v50 }
 0x117   :  { %v997_v38 = vpack.c.bf16 %v470_v56, %v469_v36 }
 0x119   :  { %998 = vmatprep.subr.bf16.mxu0 %v997_v38 }
 0x11a   :  { %v313_v40 = vpop.permute.xlu1 %312  ;;  %1000 = vmatpush3.bf16.msra.mxu0 %v997_v38 }
 0x11b   :  { %v340_v52 = vmul.f32 %v1334_v6, %v313_v40 }
 0x11d   :  { %v356_v61 = vadd.f32 %v340_v52, %v256_v39 }
 0x11f   :  { %v136_v42 = vpop.permute.xlu1 %135 }
 0x120   :  { %v161_v62 = vmul.f32 %v1332_v5, %v136_v42 }
 0x122   :  { %v257_v44 = vadd.f32 %v1339_v10, %v161_v62  ;;  %v476_v10 = vld [vmem:[%s1526_s3 + $0x8] sm:$0xff] }
 0x124   :  { %v409_v43 = vpop.permute.xlu1 %408  ;;  %v357_v20 = vadd.f32 %v341_v18, %v257_v44 }
 0x125   :  { %v439_v54 = vmul.f32 %v1342_v12, %v409_v43 }
 0x127   :  { %v455_v2 = vadd.f32 %v439_v54, %v355_v57 }
 0x128   :  { %v413_v58 = vpop.permute.xlu1 %412 }
 0x129   :  { %v440_v3 = vmul.f32 %v1342_v12, %v413_v58  ;;  %v471_v63 = vmax.f32 %v455_v2, 0.0 }
 0x12a   :  { %v520_v56 = vpop.permute.xlu0 %519 }
 0x12b   :  { %v456_v7 = vadd.f32 %v440_v3, %v356_v61 }
 0x12d   :  { %v472_v51 = vmax.f32 %v456_v7, 0.0  ;;  %v241_v8 = vpop.permute.xlu1 %240 }
 0x12e   :  { %v258_v49 = vadd.f32 %v241_v8, %v162_v59 }
 0x12f   :  { %v1001_v9 = vpack.c.bf16 %v472_v51, %v471_v63 }
 0x131   :  { %1002 = vmatprep.subr.bf16.mxu0 %v1001_v9 }
 0x132   :  { %v321_v13 = vpop.permute.xlu1 %320  ;;  %1004 = vmatpush3.bf16.msra.mxu0 %v1001_v9 }
 0x133   :  { %v342_v15 = vmul.f32 %v1334_v6, %v321_v13  ;;  %v478_v6 = vld [vmem:[%s1526_s3 + $0x18] sm:$0xff] }
 0x135   :  { %v358_v17 = vadd.f32 %v342_v15, %v258_v49 }
 0x137   :  { %v417_v19 = vpop.permute.xlu1 %416  ;;  %v458_v0 = vadd.f32 %v442_v16, %v358_v17 }
 0x138   :  { %v441_v21 = vmul.f32 %v1342_v12, %v417_v19  ;;  %v479_v12 = vld [vmem:[%s1526_s3 + $0x20] sm:$0xff] }
 0x139   :  { %v474_v5 = vmax.f32 %v458_v0, 0.0 }
 0x13a   :  { %v457_v4 = vadd.f32 %v441_v21, %v357_v20 }
 0x13c   :  { %v473_v22 = vmax.f32 %v457_v4, 0.0 }
 0x13e   :  { %v1005_v23 = vpack.c.bf16 %v474_v5, %v473_v22 }
 0x140   :  { %1006 = vmatprep.subr.bf16.mxu0 %v1005_v23 }
 0x141   :  { %1008 = vmatpush3.bf16.msra.mxu0 %v1005_v23 }
 0x144   :  { %919 = vmatmul.mubr.f32.vlgmr.msra.gmra.mrb[0].mxu0 %v476_v10  ;;  %v510_v35 = vpop.permute.xlu1 %509 }
 0x145   :  { %921 = vmatprep.mubr.f32.mxu0 %v477_v24 }
 0x148   :  { %922 = vmatmul.mubr.f32.gmra.mrb[2].mxu0 %v478_v6  ;;  %v515_v36 = vpop.permute.xlu1 %514 }
 0x149   :  { %924 = vmatprep.mubr.f32.mxu0 %v479_v12 }
 0x14a   :  { %v535_v38 = vpop.permute.xlu0 %534 }
 0x14c   :  { %925 = vmatmul.mubr.f32.gmra.mrb[4].mxu0 %v480_v25  ;;  %v525_v37 = vpop.permute.xlu1 %524 }
 0x14d   :  { %927 = vmatprep.mubr.f32.mxu0 %v481_v26 }
 0x14e   :  { %v545_v43 = vpop.permute.xlu0 %544 }
 0x150   :  { %928 = vmatmul.mubr.f32.gmra.mrb[6].mxu0 %v482_v27  ;;  %v530_v40 = vpop.permute.xlu1 %529 }
 0x151   :  { %930 = vmatprep.mubr.f32.mxu0 %v483_v28 }
 0x152   :  { %v555_v51 = vpop.permute.xlu0 %554 }
 0x154   :  { %931 = vmatmul.mubr.f32.gmra.mrb[8].mxu0 %v484_v29  ;;  %v540_v54 = vpop.permute.xlu1 %539 }
 0x155   :  { %933 = vmatprep.mubr.f32.mxu0 %v485_v30 }
 0x156   :  { %v565_v18 = vpop.permute.xlu0 %564 }
 0x158   :  { %934 = vmatmul.mubr.f32.gmra.mrb[10].mxu0 %v486_v46  ;;  %v550_v62 = vpop.permute.xlu1 %549 }
 0x159   :  { %936 = vmatprep.mubr.f32.mxu0 %v487_v14 }
 0x15a   :  { %v575_v25 = vpop.permute.xlu0 %574 }
 0x15c   :  { %937 = vmatmul.mubr.f32.gmra.mrb[12].mxu0 %v488_v48  ;;  %v560_v20 = vpop.permute.xlu1 %559 }
 0x15d   :  { %939 = vmatprep.mubr.f32.mxu0 %v489_v31 }
 0x160   :  { %940 = vmatmul.mubr.f32.gmra.mrb[14].mxu0 %v490_v32  ;;  %v570_v28 = vpop.permute.xlu1 %569 }
 0x217   :  { %v920_v53 = vpop.f32.mrb[0].mxu0 }
 0x218   :  { %v659_v42 = vadd.f32 %v920_v53, %v515_v36  ;;  %v653_v41 = vpop.f32.mrb[1].mxu0 }
 0x219   :  { %v654_v45 = vadd.f32 %v653_v41, %v510_v35  ;;  %v585_v35 = vpop.permute.xlu0 %584 }
 0x21a   :  { %v733_v47 = vmax.f32 %v659_v42, 0.0 }
 0x21b   :  { %v732_v50 = vmax.f32 %v654_v45, 0.0  ;;  %v923_v52 = vpop.f32.mrb[2].mxu0 }
 0x21c   :  { %v669_v57 = vadd.f32 %v923_v52, %v525_v37  ;;  %v663_v39 = vpop.f32.mrb[3].mxu0  ;;  %v580_v37 = vpop.permute.xlu1 %579 }
 0x21d   :  { %v664_v58 = vadd.f32 %v663_v39, %v520_v56  ;;  %v1010_v61 = vpack.c.bf16 %v733_v47, %v732_v50 }
 0x21e   :  { %v735_v2 = vmax.f32 %v669_v57, 0.0 }
 0x21f   :  { %v734_v3 = vmax.f32 %v664_v58, 0.0  ;;  %v926_v7 = vpop.f32.mrb[4].mxu0  ;;  %1011 = vmatpush3.bf16.msra.mxu1 %v1010_v61 }
 0x220   :  { %v679_v55 = vadd.f32 %v926_v7, %v535_v38  ;;  %v673_v63 = vpop.f32.mrb[5].mxu0  ;;  %1012 = vmatprep.subr.bf16.mxu1 %v1080_v33  ;;  %v753_v50 = vpop.permute.xlu1 %752 }
 0x221   :  { %v1013_v8 = vpack.c.bf16 %v735_v2, %v734_v3  ;;  %v674_v9 = vadd.f32 %v673_v63, %v530_v40  ;;  %v758_v52 = vrot.slane %v753_v50, %v145_v1 }
 0x222   :  { %v737_v59 = vmax.f32 %v679_v55, 0.0 }
 0x223   :  { %v736_v11 = vmax.f32 %v674_v9, 0.0  ;;  %v929_v13 = vpop.f32.mrb[6].mxu0  ;;  %1014 = vmatpush3.bf16.msra.mxu1 %v1013_v8 }
 0x224   :  { %v689_v49 = vadd.f32 %v929_v13, %v545_v43  ;;  %v683_v15 = vpop.f32.mrb[7].mxu0  ;;  %1015 = vmatprep.subr.bf16.mxu1 %v1080_v33  ;;  %v748_v43 = vld [vmem:[%s1529_s5] sm:$0x1] }
 0x225   :  { %v1016_v44 = vpack.c.bf16 %v737_v59, %v736_v11  ;;  %v684_v16 = vadd.f32 %v683_v15, %v540_v54 }
 0x226   :  { %v739_v17 = vmax.f32 %v689_v49, 0.0 }
 0x227   :  { %v738_v19 = vmax.f32 %v684_v16, 0.0  ;;  %v932_v0 = vpop.f32.mrb[8].mxu0  ;;  %1017 = vmatpush3.bf16.msra.mxu1 %v1016_v44 }
 0x228   :  { %v699_v21 = vadd.f32 %v932_v0, %v555_v51  ;;  %v693_v4 = vpop.f32.mrb[9].mxu0  ;;  %1018 = vmatprep.subr.bf16.mxu1 %v1080_v33 }
 0x229   :  { %v1019_v5 = vpack.c.bf16 %v739_v17, %v738_v19  ;;  %v694_v22 = vadd.f32 %v693_v4, %v550_v62 }
 0x22a   :  { %v741_v23 = vmax.f32 %v699_v21, 0.0 }
 0x22b   :  { %v740_v10 = vmax.f32 %v694_v22, 0.0  ;;  %v935_v24 = vpop.f32.mrb[10].mxu0  ;;  %1020 = vmatpush3.bf16.msra.mxu1 %v1019_v5 }
 0x22c   :  { %v709_v6 = vadd.f32 %v935_v24, %v565_v18  ;;  %v703_v12 = vpop.f32.mrb[11].mxu0  ;;  %1021 = vmatprep.subr.bf16.mxu1 %v1080_v33 }
 0x22d   :  { %v1022_v26 = vpack.c.bf16 %v741_v23, %v740_v10  ;;  %v704_v27 = vadd.f32 %v703_v12, %v560_v20 }
 0x22e   :  { %v743_v29 = vmax.f32 %v709_v6, 0.0 }
 0x22f   :  { %v742_v30 = vmax.f32 %v704_v27, 0.0  ;;  %v938_v46 = vpop.f32.mrb[12].mxu0  ;;  %1023 = vmatpush3.bf16.msra.mxu1 %v1022_v26 }
 0x230   :  { %v719_v14 = vadd.f32 %v938_v46, %v575_v25  ;;  %v713_v48 = vpop.f32.mrb[13].mxu0  ;;  %1024 = vmatprep.subr.bf16.mxu1 %v1080_v33 }
 0x231   :  { %v1025_v31 = vpack.c.bf16 %v743_v29, %v742_v30  ;;  %v714_v32 = vadd.f32 %v713_v48, %v570_v28 }
 0x232   :  { %v745_v34 = vmax.f32 %v719_v14, 0.0 }
 0x233   :  { %v744_v36 = vmax.f32 %v714_v32, 0.0  ;;  %v941_v56 = vpop.f32.mrb[14].mxu0  ;;  %1026 = vmatpush3.bf16.msra.mxu1 %v1025_v31 }
 0x234   :  { %v729_v38 = vadd.f32 %v941_v56, %v585_v35  ;;  %v723_v40 = vpop.f32.mrb[15].mxu0  ;;  %1027 = vmatprep.subr.bf16.mxu1 %v1080_v33 }
 0x235   :  { %v1028_v53 = vpack.c.bf16 %v745_v34, %v744_v36  ;;  %v724_v42 = vadd.f32 %v723_v40, %v580_v37 }
 0x236   :  { %v747_v41 = vmax.f32 %v729_v38, 0.0 }
 0x237   :  { %v746_v45 = vmax.f32 %v724_v42, 0.0  ;;  %1029 = vmatpush3.bf16.msra.mxu1 %v1028_v53 }
 0x238   :  { %1030 = vmatprep.subr.bf16.mxu1 %v1080_v33 }
 0x239   :  { %v1031_v47 = vpack.c.bf16 %v747_v41, %v746_v45 }
 0x23b   :  { %1032 = vmatpush3.bf16.msra.mxu1 %v1031_v47 }
 0x23e   :  { %975 = vmatmul.mubr.f32.vlgmr.msra.gmra.mrb[0].mxu1 %v748_v43 }
 0x311   :  { %v825_v54 = vpop.f32.mrb[0].mxu1 }
 0x312   :  { %v826_v57 = vadd.f32 %v825_v54, %v758_v52  ;;  %v976_v39 = vpop.f32.mrb[1].mxu1 }
 0x314   :  { %1075 = vtanh.f32 %v826_v57 }
 0x31e   :  { %v1076_v58 = vpop.eup %1075 }
 0x31f   :  { %v830_v61 = vmul.f32 2.0, %v1076_v58 }
 0x321   :  { %831 = vst [vmem:[%s1530_s7] sm:$0x1] %v830_v61 }

</bundles_post_ra>
